<compile_context>
chip_gen: v5e
topology: v5e:2x2
jax: 0.10.0
libtpu: 0.0.40
codegen_flags: <defaults>
</compile_context>

<pallas_src>
import math

import jax
import jax.numpy as jnp
from jax.experimental import pallas as pl
from jax.experimental.pallas import tpu as pltpu  # noqa: F401  (tiny no-grid kernel; kept for parity)

# ---------------- model sizes (small, consistent with the module) -----------
B = 2              # batch
S = 8              # sequence length
T = B * S          # total tokens = 16
INPUT = 16         # input_size (feature dim, excluding the mask channel)
H = 48             # hidden_size
NH = 3             # n_head
HD = H // NH       # head dim = 16
QKV = 3 * H        # fused q|k|v width = 144
EPS = 1e-5
SCALE = 1.0 / math.sqrt(HD)


def _rup8(n):
    return ((n + 7) // 8) * 8


# ---- row layout of the packed "data" slab (DROWS x DCOLS) ------------------
R_X = 0                      # token features            (T, INPUT)
R_BIAS = _rup8(T)            # block-diag attention bias (T, T)
R_POOL = R_BIAS + _rup8(T)   # masked pooling matrix     (B, T)
DROWS = R_POOL + _rup8(B)
DCOLS = max(INPUT, T)

# ---- row layout of the packed "params" slab (PROWS x PCOLS) ----------------
R_WIN = 0                    # (INPUT, H)
R_WQKV = _rup8(INPUT)        # (H, 3H)   fused wq|wk|wv
R_WO = R_WQKV + H            # (H, H)
R_BIN = R_WO + H             # 1 row each below
R_BQKV = R_BIN + 1
R_BO = R_BQKV + 1
R_GAMMA = R_BO + 1
R_BETA = R_GAMMA + 1
R_WOUT = R_BETA + 1          # output head stored as a row vector (1, H)
R_BOUT = R_WOUT + 1          # scalar at column 0
PROWS = _rup8(R_BOUT + 1)
PCOLS = QKV


# ------------------------------ Pallas kernel -------------------------------
def critic_kernel(d_ref, p_ref, out_ref):
    # ---- unpack the data slab (static sub-slices of one DMA'd block) ------
    xf = d_ref[R_X:R_X + T, 0:INPUT]            # (T, INPUT)
    bias = d_ref[R_BIAS:R_BIAS + T, 0:T]        # (T, T)   0 / -1e9
    pool = d_ref[R_POOL:R_POOL + B, 0:T]        # (B, T)   mask, block-diagonal

    # ---- unpack the parameter slab ----------------------------------------
    w_in = p_ref[R_WIN:R_WIN + INPUT, 0:H]      # (INPUT, H)
    w_qkv = p_ref[R_WQKV:R_WQKV + H, 0:QKV]     # (H, 3H)
    w_o = p_ref[R_WO:R_WO + H, 0:H]             # (H, H)
    b_in = p_ref[R_BIN:R_BIN + 1, 0:H]          # (1, H)
    b_qkv = p_ref[R_BQKV:R_BQKV + 1, 0:QKV]     # (1, 3H)
    b_o = p_ref[R_BO:R_BO + 1, 0:H]             # (1, H)
    gamma = p_ref[R_GAMMA:R_GAMMA + 1, 0:H]     # (1, H)
    beta = p_ref[R_BETA:R_BETA + 1, 0:H]        # (1, H)
    w_out = p_ref[R_WOUT:R_WOUT + 1, 0:H]       # (1, H)
    b_out = p_ref[R_BOUT:R_BOUT + 1, 0:1]       # (1, 1)

    # ---- input layer + ReLU -------------------------------------------------
    h = jnp.maximum(
        jnp.dot(xf, w_in, preferred_element_type=jnp.float32) + b_in, 0.0)    # (T, H)

    # ---- fused QKV projection (one MXU weight push instead of three) -------
    qkv = jnp.dot(h, w_qkv, preferred_element_type=jnp.float32) + b_qkv       # (T, 3H)

    # ---- multi-head self-attention, block-diagonal over the batch ----------
    attn = None
    for hh in range(NH):                        # static unroll over 3 heads
        lo = hh * HD
        qh = qkv[:, lo:lo + HD]                 # (T, HD)
        kh = qkv[:, H + lo:H + lo + HD]         # (T, HD)
        vh = qkv[:, 2 * H + lo:2 * H + lo + HD]  # (T, HD)
        # s[i, j] = q_i . k_j ; cross-batch pairs and masked keys get -1e9
        s = jax.lax.dot_general(qh, kh, (((1,), (1,)), ((), ())),
                                preferred_element_type=jnp.float32)
        s = s * SCALE + bias                    # bias hoisted out of the head loop
        s = s - jnp.max(s, axis=-1, keepdims=True)   # numerical safety
        p = jnp.exp(s)
        p = p * pl.reciprocal(jnp.sum(p, axis=-1, keepdims=True), approx=True)
        oh = jnp.dot(p, vh, preferred_element_type=jnp.float32)               # (T, HD)
        # fold the per-head slice of the output projection (no in-kernel concat)
        proj = jnp.dot(oh, w_o[lo:lo + HD, :], preferred_element_type=jnp.float32)
        attn = proj if attn is None else attn + proj
    attn = attn + b_o                                                          # (T, H)

    # ---- residual + LayerNorm ----------------------------------------------
    z = h + attn
    mu = jnp.mean(z, axis=-1, keepdims=True)
    var = jnp.mean((z - mu) * (z - mu), axis=-1, keepdims=True)
    y = (z - mu) * jax.lax.rsqrt(var + EPS) * gamma + beta                     # (T, H)

    # ---- output head + masked sequence mean, folded algebraically ----------
    #   mean_s mask*(y_s . w_out + b_out)
    # = ((sum_s mask*y_s) . w_out) / sum(mask) + b_out
    pooled = jnp.dot(pool, y, preferred_element_type=jnp.float32)              # (B, H)
    den = jnp.sum(pool, axis=-1, keepdims=True)                                # (B, 1)
    num = jnp.sum(pooled * w_out, axis=-1, keepdims=True)                      # (B, 1)
    out_ref[...] = num * pl.reciprocal(den, approx=False) + b_out


# ------------------------------ packing helpers ------------------------------
def pack_params(p):
    """Pack all weights/biases into one (PROWS, PCOLS) f32 slab (built once)."""
    P = jnp.zeros((PROWS, PCOLS), jnp.float32)
    P = P.at[R_WIN:R_WIN + INPUT, 0:H].set(p['w_in'])
    P = P.at[R_WQKV:R_WQKV + H, 0:QKV].set(
        jnp.concatenate([p['wq'], p['wk'], p['wv']], axis=1))
    P = P.at[R_WO:R_WO + H, 0:H].set(p['wo'])
    P = P.at[R_BIN, 0:H].set(p['b_in'][0])
    P = P.at[R_BQKV, 0:QKV].set(jnp.concatenate([p['bq'][0], p['bk'][0], p['bv'][0]]))
    P = P.at[R_BO, 0:H].set(p['bo'][0])
    P = P.at[R_GAMMA, 0:H].set(p['gamma'][0])
    P = P.at[R_BETA, 0:H].set(p['beta'][0])
    P = P.at[R_WOUT, 0:H].set(p['w_out'][:, 0])
    P = P.at[R_BOUT, 0].set(p['b_out'][0, 0])
    return P


def pack_data(x):
    """Pack features + block-diag attention bias + pooling matrix into one slab.

    The batch-structure patterns (`same`, batch one-hot) are static and get
    constant-folded by XLA under jit; per call only the mask-dependent
    where/select and the slab scatter remain (a few tiny fused VPU ops).
    """
    xf = x[:, :, :-1].reshape(T, INPUT)
    mask = x[:, :, -1].reshape(T)                                  # (T,)
    batch_id = jnp.repeat(jnp.arange(B), S)                        # (T,)  static
    same = batch_id[:, None] == batch_id[None, :]                  # (T, T) static
    bias = jnp.where(same & (mask[None, :] > 0.0), 0.0, -1e9).astype(jnp.float32)
    pool = jnp.where(jnp.arange(B)[:, None] == batch_id[None, :],
                     mask[None, :], 0.0).astype(jnp.float32)       # (B, T)
    D = jnp.zeros((DROWS, DCOLS), jnp.float32)
    D = D.at[R_X:R_X + T, 0:INPUT].set(xf)
    D = D.at[R_BIAS:R_BIAS + T, 0:T].set(bias)
    D = D.at[R_POOL:R_POOL + B, 0:T].set(pool)
    return D


# ------------------------------ wrapper --------------------------------------
@jax.jit
def model_critic_forward(x, packed_params):
    data = pack_data(x)
    return pl.pallas_call(
        critic_kernel,
        out_shape=jax.ShapeDtypeStruct((B, 1), jnp.float32),
        # Tiny problem (<100 KiB resident): no grid, both operands are
        # full-array VMEM blocks -> exactly 2 input DMAs and a single kernel
        # invocation.  A batch grid ("parallel") only pays off once many
        # sequences are stacked per call.
    )(data, packed_params)


# ------------------------ pure-JAX reference (for checking) ------------------
def model_critic_ref(x, p):
    xf, mask = x[:, :, :-1], x[:, :, -1]
    h = jax.nn.relu(jnp.einsum('bsf,fh->bsh', xf, p['w_in']) + p['b_in'][0])
    q = jnp.einsum('bsh,hd->bsd', h, p['wq']) + p['bq'][0]
    k = jnp.einsum('bsh,hd->bsd', h, p['wk']) + p['bk'][0]
    v = jnp.einsum('bsh,hd->bsd', h, p['wv']) + p['bv'][0]
    qh = q.reshape(B, S, NH, HD); kh = k.reshape(B, S, NH, HD); vh = v.reshape(B, S, NH, HD)
    s = jnp.einsum('bqnd,bknd->bnqk', qh, kh) * SCALE
    s = jnp.where(mask[:, None, None, :] > 0.0, s, -1e9)
    a = jax.nn.softmax(s, axis=-1)
    o = jnp.einsum('bnqk,bknd->bqnd', a, vh).reshape(B, S, H)
    o = jnp.einsum('bsh,hk->bsk', o, p['wo']) + p['bo'][0]
    z = h + o
    mu = jnp.mean(z, -1, keepdims=True)
    var = jnp.mean((z - mu) ** 2, -1, keepdims=True)
    y = (z - mu) / jnp.sqrt(var + EPS) * p['gamma'][0] + p['beta'][0]
    logits = (jnp.einsum('bsh,hk->bsk', y, p['w_out']) + p['b_out'][0])[..., 0]
    return (jnp.sum(logits * mask, -1, keepdims=True)
            / jnp.sum(mask, -1, keepdims=True))


# ------------------------------ params / inputs ------------------------------
def init_params(key):
    def linear(key, fan_in, fan_out):
        kw, kb = jax.random.split(key)
        bound = 1.0 / math.sqrt(fan_in)
        w = jax.random.uniform(kw, (fan_in, fan_out), jnp.float32, -bound, bound)
        b = jax.random.uniform(kb, (1, fan_out), jnp.float32, -bound, bound)
        return w, b

    ks = jax.random.split(key, 6)
    p = {}
    p['w_in'], p['b_in'] = linear(ks[0], INPUT, H)
    p['wq'], p['bq'] = linear(ks[1], H, H)
    p['wk'], p['bk'] = linear(ks[2], H, H)
    p['wv'], p['bv'] = linear(ks[3], H, H)
    p['wo'], p['bo'] = linear(ks[4], H, H)
    p['gamma'] = jnp.ones((1, H), jnp.float32)
    p['beta'] = jnp.zeros((1, H), jnp.float32)
    p['w_out'], p['b_out'] = linear(ks[5], H, 1)
    return p


if __name__ == "__main__":
    key = jax.random.PRNGKey(0)
    kp, kx = jax.random.split(key)
    params = init_params(kp)
    packed = pack_params(params)          # params slab built once

    feats = jax.random.normal(kx, (B, S, INPUT), jnp.float32)
    # mask: first batch fully valid, second batch half valid
    lengths = jnp.array([S, S // 2])
    mask = (jnp.arange(S)[None, :] < lengths[:, None]).astype(jnp.float32)
    x = jnp.concatenate([feats, mask[..., None]], axis=-1)   # (B, S, INPUT+1)

    out = model_critic_forward(x, packed)
    out = jax.block_until_ready(out)

    ref = model_critic_ref(x, params)
    assert out.shape == (B, 1)
    # 1e-3 tolerance: softmax denominator uses the EUP approx reciprocal.
    assert jnp.allclose(out, ref, atol=1e-3, rtol=1e-3), (out, ref)
    print("KERNEL_OK")
</pallas_src>

<mosaic_0001>
module attributes {stable_mosaic.version = 11 : i64} {
  func.func @critic_kernel(%arg0: memref<40x16xf32, #tpu.memory_space<vmem>>, %arg1: memref<120x144xf32, #tpu.memory_space<vmem>>, %arg2: memref<2x1xf32, #tpu.memory_space<vmem>>) attributes {dimension_semantics = [], scalar_prefetch = 0 : i64, scratch_operands = 0 : i64, tpu.core_type = #tpu.core_type<tc>} {
    %c0 = arith.constant 0 : index
    %c0_0 = arith.constant 0 : index
    %0 = vector.load %arg0[%c0, %c0_0] : memref<40x16xf32, #tpu.memory_space<vmem>>, vector<16x16xf32>
    %c16 = arith.constant 16 : index
    %c0_1 = arith.constant 0 : index
    %1 = vector.load %arg0[%c16, %c0_1] : memref<40x16xf32, #tpu.memory_space<vmem>>, vector<16x16xf32>
    %c32 = arith.constant 32 : index
    %c0_2 = arith.constant 0 : index
    %2 = vector.load %arg0[%c32, %c0_2] : memref<40x16xf32, #tpu.memory_space<vmem>>, vector<2x16xf32>
    %c0_3 = arith.constant 0 : index
    %c0_4 = arith.constant 0 : index
    %3 = vector.load %arg1[%c0_3, %c0_4] : memref<120x144xf32, #tpu.memory_space<vmem>>, vector<16x48xf32>
    %c16_5 = arith.constant 16 : index
    %c0_6 = arith.constant 0 : index
    %4 = vector.load %arg1[%c16_5, %c0_6] : memref<120x144xf32, #tpu.memory_space<vmem>>, vector<48x144xf32>
    %c64 = arith.constant 64 : index
    %c0_7 = arith.constant 0 : index
    %5 = vector.load %arg1[%c64, %c0_7] : memref<120x144xf32, #tpu.memory_space<vmem>>, vector<48x48xf32>
    %c112 = arith.constant 112 : index
    %c0_8 = arith.constant 0 : index
    %6 = vector.load %arg1[%c112, %c0_8] : memref<120x144xf32, #tpu.memory_space<vmem>>, vector<1x48xf32>
    %c113 = arith.constant 113 : index
    %c0_9 = arith.constant 0 : index
    %7 = vector.load %arg1[%c113, %c0_9] : memref<120x144xf32, #tpu.memory_space<vmem>>, vector<1x144xf32>
    %c114 = arith.constant 114 : index
    %c0_10 = arith.constant 0 : index
    %8 = vector.load %arg1[%c114, %c0_10] : memref<120x144xf32, #tpu.memory_space<vmem>>, vector<1x48xf32>
    %c115 = arith.constant 115 : index
    %c0_11 = arith.constant 0 : index
    %9 = vector.load %arg1[%c115, %c0_11] : memref<120x144xf32, #tpu.memory_space<vmem>>, vector<1x48xf32>
    %c116 = arith.constant 116 : index
    %c0_12 = arith.constant 0 : index
    %10 = vector.load %arg1[%c116, %c0_12] : memref<120x144xf32, #tpu.memory_space<vmem>>, vector<1x48xf32>
    %c117 = arith.constant 117 : index
    %c0_13 = arith.constant 0 : index
    %11 = vector.load %arg1[%c117, %c0_13] : memref<120x144xf32, #tpu.memory_space<vmem>>, vector<1x48xf32>
    %c118 = arith.constant 118 : index
    %c0_14 = arith.constant 0 : index
    %12 = vector.load %arg1[%c118, %c0_14] : memref<120x144xf32, #tpu.memory_space<vmem>>, vector<1x1xf32>
    %cst = arith.constant dense<0.000000e+00> : vector<16x48xf32>
    %13 = tpu.matmul %0, %3, %cst {dimension_numbers = #tpu.dot_dimension_numbers<[1], [0], [0], [1], [0, 0, 1, 1], [], []>} : vector<16x16xf32>, vector<16x48xf32>, vector<16x48xf32> -> vector<16x48xf32>
    %14 = vector.broadcast %6 : vector<1x48xf32> to vector<16x48xf32>
    %15 = arith.addf %13, %14 : vector<16x48xf32>
    %cst_15 = arith.constant 0.000000e+00 : f32
    %16 = vector.broadcast %cst_15 : f32 to vector<16x48xf32>
    %17 = arith.maximumf %15, %16 : vector<16x48xf32>
    %cst_16 = arith.constant dense<0.000000e+00> : vector<16x144xf32>
    %18 = tpu.matmul %17, %4, %cst_16 {dimension_numbers = #tpu.dot_dimension_numbers<[1], [0], [0], [1], [0, 0, 1, 1], [], []>} : vector<16x48xf32>, vector<48x144xf32>, vector<16x144xf32> -> vector<16x144xf32>
    %19 = vector.broadcast %7 : vector<1x144xf32> to vector<16x144xf32>
    %20 = arith.addf %18, %19 : vector<16x144xf32>
    %21 = vector.extract_strided_slice %20 {offsets = [0, 0], sizes = [16, 16], strides = [1, 1]} : vector<16x144xf32> to vector<16x16xf32>
    %22 = vector.extract_strided_slice %20 {offsets = [0, 48], sizes = [16, 16], strides = [1, 1]} : vector<16x144xf32> to vector<16x16xf32>
    %23 = vector.extract_strided_slice %20 {offsets = [0, 96], sizes = [16, 16], strides = [1, 1]} : vector<16x144xf32> to vector<16x16xf32>
    %cst_17 = arith.constant dense<0.000000e+00> : vector<16x16xf32>
    %24 = tpu.matmul %21, %22, %cst_17 {dimension_numbers = #tpu.dot_dimension_numbers<[1], [1], [0], [0], [0, 0, 1, 0], [], []>} : vector<16x16xf32>, vector<16x16xf32>, vector<16x16xf32> -> vector<16x16xf32>
    %cst_18 = arith.constant 2.500000e-01 : f32
    %25 = vector.broadcast %cst_18 : f32 to vector<16x16xf32>
    %26 = arith.mulf %24, %25 : vector<16x16xf32>
    %27 = arith.addf %26, %1 : vector<16x16xf32>
    %cst_19 = arith.constant dense<0xFF800000> : vector<16xf32>
    %28 = vector.multi_reduction <maximumf>, %27, %cst_19 [1] : vector<16x16xf32> to vector<16xf32>
    %29 = vector.shape_cast %28 : vector<16xf32> to vector<16x1xf32>
    %30 = vector.broadcast %29 : vector<16x1xf32> to vector<16x16xf32>
    %31 = arith.subf %27, %30 : vector<16x16xf32>
    %32 = math.exp %31 : vector<16x16xf32>
    %cst_20 = arith.constant dense<0.000000e+00> : vector<16xf32>
    %33 = vector.multi_reduction <add>, %32, %cst_20 [1] : vector<16x16xf32> to vector<16xf32>
    %34 = vector.shape_cast %33 : vector<16xf32> to vector<16x1xf32>
    %35 = tpu.reciprocal %34 {approx = true} : vector<16x1xf32> -> vector<16x1xf32>
    %36 = vector.broadcast %35 : vector<16x1xf32> to vector<16x16xf32>
    %37 = arith.mulf %32, %36 : vector<16x16xf32>
    %cst_21 = arith.constant dense<0.000000e+00> : vector<16x16xf32>
    %38 = tpu.matmul %37, %23, %cst_21 {dimension_numbers = #tpu.dot_dimension_numbers<[1], [0], [0], [1], [0, 0, 1, 1], [], []>} : vector<16x16xf32>, vector<16x16xf32>, vector<16x16xf32> -> vector<16x16xf32>
    %39 = vector.extract_strided_slice %5 {offsets = [0, 0], sizes = [16, 48], strides = [1, 1]} : vector<48x48xf32> to vector<16x48xf32>
    %cst_22 = arith.constant dense<0.000000e+00> : vector<16x48xf32>
    %40 = tpu.matmul %38, %39, %cst_22 {dimension_numbers = #tpu.dot_dimension_numbers<[1], [0], [0], [1], [0, 0, 1, 1], [], []>} : vector<16x16xf32>, vector<16x48xf32>, vector<16x48xf32> -> vector<16x48xf32>
    %41 = vector.extract_strided_slice %20 {offsets = [0, 16], sizes = [16, 16], strides = [1, 1]} : vector<16x144xf32> to vector<16x16xf32>
    %42 = vector.extract_strided_slice %20 {offsets = [0, 64], sizes = [16, 16], strides = [1, 1]} : vector<16x144xf32> to vector<16x16xf32>
    %43 = vector.extract_strided_slice %20 {offsets = [0, 112], sizes = [16, 16], strides = [1, 1]} : vector<16x144xf32> to vector<16x16xf32>
    %cst_23 = arith.constant dense<0.000000e+00> : vector<16x16xf32>
    %44 = tpu.matmul %41, %42, %cst_23 {dimension_numbers = #tpu.dot_dimension_numbers<[1], [1], [0], [0], [0, 0, 1, 0], [], []>} : vector<16x16xf32>, vector<16x16xf32>, vector<16x16xf32> -> vector<16x16xf32>
    %cst_24 = arith.constant 2.500000e-01 : f32
    %45 = vector.broadcast %cst_24 : f32 to vector<16x16xf32>
    %46 = arith.mulf %44, %45 : vector<16x16xf32>
    %47 = arith.addf %46, %1 : vector<16x16xf32>
    %cst_25 = arith.constant dense<0xFF800000> : vector<16xf32>
    %48 = vector.multi_reduction <maximumf>, %47, %cst_25 [1] : vector<16x16xf32> to vector<16xf32>
    %49 = vector.shape_cast %48 : vector<16xf32> to vector<16x1xf32>
    %50 = vector.broadcast %49 : vector<16x1xf32> to vector<16x16xf32>
    %51 = arith.subf %47, %50 : vector<16x16xf32>
    %52 = math.exp %51 : vector<16x16xf32>
    %cst_26 = arith.constant dense<0.000000e+00> : vector<16xf32>
    %53 = vector.multi_reduction <add>, %52, %cst_26 [1] : vector<16x16xf32> to vector<16xf32>
    %54 = vector.shape_cast %53 : vector<16xf32> to vector<16x1xf32>
    %55 = tpu.reciprocal %54 {approx = true} : vector<16x1xf32> -> vector<16x1xf32>
    %56 = vector.broadcast %55 : vector<16x1xf32> to vector<16x16xf32>
    %57 = arith.mulf %52, %56 : vector<16x16xf32>
    %cst_27 = arith.constant dense<0.000000e+00> : vector<16x16xf32>
    %58 = tpu.matmul %57, %43, %cst_27 {dimension_numbers = #tpu.dot_dimension_numbers<[1], [0], [0], [1], [0, 0, 1, 1], [], []>} : vector<16x16xf32>, vector<16x16xf32>, vector<16x16xf32> -> vector<16x16xf32>
    %59 = vector.extract_strided_slice %5 {offsets = [16, 0], sizes = [16, 48], strides = [1, 1]} : vector<48x48xf32> to vector<16x48xf32>
    %cst_28 = arith.constant dense<0.000000e+00> : vector<16x48xf32>
    %60 = tpu.matmul %58, %59, %cst_28 {dimension_numbers = #tpu.dot_dimension_numbers<[1], [0], [0], [1], [0, 0, 1, 1], [], []>} : vector<16x16xf32>, vector<16x48xf32>, vector<16x48xf32> -> vector<16x48xf32>
    %61 = arith.addf %40, %60 : vector<16x48xf32>
    %62 = vector.extract_strided_slice %20 {offsets = [0, 32], sizes = [16, 16], strides = [1, 1]} : vector<16x144xf32> to vector<16x16xf32>
    %63 = vector.extract_strided_slice %20 {offsets = [0, 80], sizes = [16, 16], strides = [1, 1]} : vector<16x144xf32> to vector<16x16xf32>
    %64 = vector.extract_strided_slice %20 {offsets = [0, 128], sizes = [16, 16], strides = [1, 1]} : vector<16x144xf32> to vector<16x16xf32>
    %cst_29 = arith.constant dense<0.000000e+00> : vector<16x16xf32>
    %65 = tpu.matmul %62, %63, %cst_29 {dimension_numbers = #tpu.dot_dimension_numbers<[1], [1], [0], [0], [0, 0, 1, 0], [], []>} : vector<16x16xf32>, vector<16x16xf32>, vector<16x16xf32> -> vector<16x16xf32>
    %cst_30 = arith.constant 2.500000e-01 : f32
    %66 = vector.broadcast %cst_30 : f32 to vector<16x16xf32>
    %67 = arith.mulf %65, %66 : vector<16x16xf32>
    %68 = arith.addf %67, %1 : vector<16x16xf32>
    %cst_31 = arith.constant dense<0xFF800000> : vector<16xf32>
    %69 = vector.multi_reduction <maximumf>, %68, %cst_31 [1] : vector<16x16xf32> to vector<16xf32>
    %70 = vector.shape_cast %69 : vector<16xf32> to vector<16x1xf32>
    %71 = vector.broadcast %70 : vector<16x1xf32> to vector<16x16xf32>
    %72 = arith.subf %68, %71 : vector<16x16xf32>
    %73 = math.exp %72 : vector<16x16xf32>
    %cst_32 = arith.constant dense<0.000000e+00> : vector<16xf32>
    %74 = vector.multi_reduction <add>, %73, %cst_32 [1] : vector<16x16xf32> to vector<16xf32>
    %75 = vector.shape_cast %74 : vector<16xf32> to vector<16x1xf32>
    %76 = tpu.reciprocal %75 {approx = true} : vector<16x1xf32> -> vector<16x1xf32>
    %77 = vector.broadcast %76 : vector<16x1xf32> to vector<16x16xf32>
    %78 = arith.mulf %73, %77 : vector<16x16xf32>
    %cst_33 = arith.constant dense<0.000000e+00> : vector<16x16xf32>
    %79 = tpu.matmul %78, %64, %cst_33 {dimension_numbers = #tpu.dot_dimension_numbers<[1], [0], [0], [1], [0, 0, 1, 1], [], []>} : vector<16x16xf32>, vector<16x16xf32>, vector<16x16xf32> -> vector<16x16xf32>
    %80 = vector.extract_strided_slice %5 {offsets = [32, 0], sizes = [16, 48], strides = [1, 1]} : vector<48x48xf32> to vector<16x48xf32>
    %cst_34 = arith.constant dense<0.000000e+00> : vector<16x48xf32>
    %81 = tpu.matmul %79, %80, %cst_34 {dimension_numbers = #tpu.dot_dimension_numbers<[1], [0], [0], [1], [0, 0, 1, 1], [], []>} : vector<16x16xf32>, vector<16x48xf32>, vector<16x48xf32> -> vector<16x48xf32>
    %82 = arith.addf %61, %81 : vector<16x48xf32>
    %83 = vector.broadcast %8 : vector<1x48xf32> to vector<16x48xf32>
    %84 = arith.addf %82, %83 : vector<16x48xf32>
    %85 = arith.addf %17, %84 : vector<16x48xf32>
    %cst_35 = arith.constant dense<0.000000e+00> : vector<16xf32>
    %86 = vector.multi_reduction <add>, %85, %cst_35 [1] : vector<16x48xf32> to vector<16xf32>
    %87 = vector.shape_cast %86 : vector<16xf32> to vector<16x1xf32>
    %cst_36 = arith.constant 4.800000e+01 : f32
    %88 = vector.broadcast %cst_36 : f32 to vector<16x1xf32>
    %89 = arith.divf %87, %88 : vector<16x1xf32>
    %90 = vector.broadcast %89 : vector<16x1xf32> to vector<16x48xf32>
    %91 = arith.subf %85, %90 : vector<16x48xf32>
    %92 = vector.broadcast %89 : vector<16x1xf32> to vector<16x48xf32>
    %93 = arith.subf %85, %92 : vector<16x48xf32>
    %94 = arith.mulf %91, %93 : vector<16x48xf32>
    %cst_37 = arith.constant dense<0.000000e+00> : vector<16xf32>
    %95 = vector.multi_reduction <add>, %94, %cst_37 [1] : vector<16x48xf32> to vector<16xf32>
    %96 = vector.shape_cast %95 : vector<16xf32> to vector<16x1xf32>
    %cst_38 = arith.constant 4.800000e+01 : f32
    %97 = vector.broadcast %cst_38 : f32 to vector<16x1xf32>
    %98 = arith.divf %96, %97 : vector<16x1xf32>
    %99 = vector.broadcast %89 : vector<16x1xf32> to vector<16x48xf32>
    %100 = arith.subf %85, %99 : vector<16x48xf32>
    %cst_39 = arith.constant 9.99999974E-6 : f32
    %101 = vector.broadcast %cst_39 : f32 to vector<16x1xf32>
    %102 = arith.addf %98, %101 : vector<16x1xf32>
    %103 = math.rsqrt %102 : vector<16x1xf32>
    %104 = vector.broadcast %103 : vector<16x1xf32> to vector<16x48xf32>
    %105 = arith.mulf %100, %104 : vector<16x48xf32>
    %106 = vector.broadcast %9 : vector<1x48xf32> to vector<16x48xf32>
    %107 = arith.mulf %105, %106 : vector<16x48xf32>
    %108 = vector.broadcast %10 : vector<1x48xf32> to vector<16x48xf32>
    %109 = arith.addf %107, %108 : vector<16x48xf32>
    %cst_40 = arith.constant dense<0.000000e+00> : vector<2x48xf32>
    %110 = tpu.matmul %2, %109, %cst_40 {dimension_numbers = #tpu.dot_dimension_numbers<[1], [0], [0], [1], [0, 0, 1, 1], [], []>} : vector<2x16xf32>, vector<16x48xf32>, vector<2x48xf32> -> vector<2x48xf32>
    %cst_41 = arith.constant dense<0.000000e+00> : vector<2xf32>
    %111 = vector.multi_reduction <add>, %2, %cst_41 [1] : vector<2x16xf32> to vector<2xf32>
    %112 = vector.shape_cast %111 : vector<2xf32> to vector<2x1xf32>
    %113 = vector.broadcast %11 : vector<1x48xf32> to vector<2x48xf32>
    %114 = arith.mulf %110, %113 : vector<2x48xf32>
    %cst_42 = arith.constant dense<0.000000e+00> : vector<2xf32>
    %115 = vector.multi_reduction <add>, %114, %cst_42 [1] : vector<2x48xf32> to vector<2xf32>
    %116 = vector.shape_cast %115 : vector<2xf32> to vector<2x1xf32>
    %117 = tpu.reciprocal %112 : vector<2x1xf32> -> vector<2x1xf32>
    %118 = arith.mulf %116, %117 : vector<2x1xf32>
    %119 = vector.broadcast %12 : vector<1x1xf32> to vector<2x1xf32>
    %120 = arith.addf %118, %119 : vector<2x1xf32>
    %c0_43 = arith.constant 0 : index
    %c0_44 = arith.constant 0 : index
    %121 = vector.load %arg2[%c0_43, %c0_44] : memref<2x1xf32, #tpu.memory_space<vmem>>, vector<2x1xf32>
    tpu.vector_store %arg2[%c0_43, %c0_44], %120 {strides = array<i32>} : memref<2x1xf32, #tpu.memory_space<vmem>>, vector<2x1xf32>,
    return
  }
}

</mosaic_0001>

<bundles_post_ra>
// kernel: eq.15
= control target key start
LH: loop header
LB: loop body
LE: loop exit
PB: predicated region body
PF: predicated region fallthrough
CT: control target
= control target key end

     0   :  { %vm7_vm0 = vcmask 64512   ;;  %vm13_vm1 = vcmask 130112   ;;  %s39_s0 = inlined_call_operand.vmem [shape: s32[2,8], index: 0, kind: input, shape index: {}]   ;;  %s40_s1 = inlined_call_operand.vmem [shape: s32[16], index: 1, kind: output, shape index: {}]  }
   0x1   :  { %v4_v0 = vld [vmem:[%s39_s0] sm:$0x3]  ;;  %s22_s0 = smov 8  }
   0x2   :  { %5 = vst [vmem:[#allocation1] sm:$0x3] %v4_v0 }
   0x9   :  { %v10_v1 = vld [vmem:[#allocation1 + $0x1] sm:$0x1]   ;;  %v6_v2 = vld [vmem:[#allocation1] sm:$0x1]  }
   0xa   :  { %11 = vrot.lane.b32.xlu0 %v10_v1, %s22_s0  ;;  %8 = vst.msk [vmem:[#allocation0] sm:$0x1] %vm7_vm0, %v6_v2  }
  0x7c   :  { %v12_v3 = vpop.permute.xlu0 %11  }
  0x7d   :  { %14 = vst.msk [vmem:[#allocation0] sm:$0x1] %vm13_vm1, %v12_v3  }
  0x84   :  { %v17_v4 = vld [vmem:[#allocation0] sm:$0x1] }
  0x85   :  { %20 = vst [vmem:[%s40_s1] sm:$0x1] %v17_v4 }

// kernel: model_critic_forward.1
= control target key start
LH: loop header
LB: loop body
LE: loop exit
PB: predicated region body
PF: predicated region fallthrough
CT: control target
= control target key end

     0   :  { %vm44_vm0 = vcmask 130048   ;;  %vm81_vm1 = vcmask 392192   ;;  %s710_s17 = smov 112   ;;  %s711_s18 = smov 64   ;;  %vm597_vm3 = vcmask 123904   ;;  %vm602_vm10 = vcmask 386048   ;;  %s911_s1 = inlined_call_operand.vmem [shape: f32[120,144], index: 1, kind: input, shape index: {}]   ;;  %s912_s0 = inlined_call_operand.vmem [shape: f32[40,16], index: 0, kind: input, shape index: {}]   ;;  %s913_s2 = inlined_call_operand.vmem [shape: f32[2,1], index: 2, kind: output, shape index: {}]  }
   0x1   :  { %v17_v0 = vld [vmem:[%s911_s1 + $0x10] sm:$0xff]  ;;  %v16_v1 = vld [vmem:[%s911_s1] sm:$0xff]  ;;  %v29_v4 = vld [vmem:[%s911_s1 + $0x78] sm:$0xff]  ;;  %s712_s19 = smov 80   ;;  %s713_s20 = smov 96   ;;  %vm622_vm15 = vcmask 1024  }
   0x2   :  { %65 = vmatpush.msra.mxu0 %v17_v0  ;;  %v11_v2 = vld [vmem:[%s912_s0] sm:$0xff]  ;;  %v28_v3 = vld [vmem:[%s911_s1 + $0x70] sm:$0xff]  ;;  %121 = vmatpush.msra.mxu2 %v29_v4  ;;  %v27_v6 = vld [vmem:[%s911_s1 + $0x68] sm:$0xff]  ;;  %s714_s21 = smov 48   ;;  %s715_s26 = smov 16  }
   0x3   :  { %98 = vmatpush.msra.mxu1 %v28_v3  ;;  %v26_v5 = vld [vmem:[%s911_s1 + $0x60] sm:$0xff]  ;;  %v24_v7 = vld [vmem:[%s911_s1 + $0x50] sm:$0xff]  ;;  %v25_v8 = vld [vmem:[%s911_s1 + $0x58] sm:$0xff]  ;;  %s716_s27 = smov 32  }
   0x4   :  { %66 = vmatpush.msra.mxu0 %v16_v1  ;;  %122 = vmatpush.msra.mxu2 %v27_v6  ;;  %v12_v9 = vld [vmem:[%s912_s0 + $0x8] sm:$0xff]  ;;  %v22_v10 = vld [vmem:[%s911_s1 + $0x40] sm:$0xff]  ;;  %v20_v12 = vld [vmem:[%s911_s1 + $0x30] sm:$0xff] }
   0x5   :  { %629 = vmatmul.msk.f32.vlgmr.msra.gmra.mxu0 %vm44_vm0, %v11_v2  ;;  %99 = vmatpush.msra.mxu1 %v26_v5  ;;  %v23_v11 = vld [vmem:[%s911_s1 + $0x48] sm:$0xff]  ;;  %v21_v13 = vld [vmem:[%s911_s1 + $0x38] sm:$0xff]  ;;  %v18_v14 = vld [vmem:[%s911_s1 + $0x20] sm:$0xff] }
   0x6   :  { %123 = vmatpush.msra.mxu2 %v25_v8  ;;  %v19_v15 = vld [vmem:[%s911_s1 + $0x28] sm:$0xff]  ;;  %v36_v16 = vld [vmem:[%s911_s1 + $0xe0] ss:$0 sm:$0xff]  ;;  %v13_v43 = vld [vmem:[%s912_s0 + $0x10] sm:$0xff] }
   0x7   :  { %100 = vmatpush.msra.mxu1 %v24_v7  ;;  %v801_v23 = vld [vmem:[%s911_s1 + $0xe1] ss:$8 sm:$0x3]  ;;  %v14_v48 = vld [vmem:[%s912_s0 + $0x18] sm:$0xff] }
   0x8   :  { %124 = vmatpush.msra.mxu2 %v23_v11  ;;  %v77_v24 = vperm.slane %v801_v23, 0 }
   0x9   :  { %101 = vmatpush.msra.mxu1 %v22_v10 }
   0xa   :  { %125 = vmatpush.msra.mxu2 %v21_v13 }
   0xb   :  { %102 = vmatpush.msra.mxu1 %v20_v12 }
   0xc   :  { %126 = vmatpush.msra.mxu2 %v19_v15 }
   0xd   :  { %630 = vmatmul.msk.f32.gmra.mxu0 %vm44_vm0, %v12_v9  ;;  %103 = vmatpush.msra.mxu1 %v18_v14 }
  0x82   :  { %v68_v17 = vpop.f32.mrf.mxu0 }
  0x83   :  { %v69_v18 = vadd.f32 %v68_v17, %v36_v16 }
  0x85   :  { %v786_v19 = vmax.f32 %v69_v18, 0.0 }
  0x87   :  { %631 = vmatmul.msk.f32.vlgmr.msra.gmra.mxu1 %vm81_vm1, %v786_v19  ;;  %633 = vmatmul.msk.f32.vlgmr.msra.gmra.mxu2 %vm81_vm1, %v786_v19 }
  0x8a   :  { %v71_v20 = vpop.f32.mrf.mxu0 }
  0x8b   :  { %v72_v21 = vadd.f32 %v71_v20, %v36_v16 }
  0x8d   :  { %v792_v22 = vmax.f32 %v72_v21, 0.0 }
  0x8f   :  { %632 = vmatmul.msk.f32.gmra.mxu1 %vm81_vm1, %v792_v22  ;;  %634 = vmatmul.msk.f32.gmra.mxu2 %vm81_vm1, %v792_v22 }
 0x104   :  { %v105_v25 = vpop.f32.mrf.mxu1 }
 0x105   :  { %v804_v26 = vadd.f32 %v105_v25, %v77_v24 }
 0x107   :  { %232 = vrot.lane.b32.xlu2 %v804_v26, %s710_s17 }
 0x10c   :  { %v108_v27 = vpop.f32.mrf.mxu1 }
 0x10d   :  { %v807_v28 = vadd.f32 %v108_v27, %v77_v24 }
 0x10f   :  { %238 = vrot.lane.b32.xlu1 %v807_v28, %s711_s18  ;;  %138 = vrot.lane.b32.xlu0 %v807_v28, %s712_s19  ;;  %v668_v1 = vpack.i.bf16 %v804_v26, %v807_v28 }
 0x110   :  { %234 = vrot.lane.b32.xlu2 %v807_v28, %s710_s17 }
 0x117   :  { %236 = vrot.lane.b32.xlu1 %v804_v26, %s711_s18  ;;  %136 = vrot.lane.b32.xlu0 %v804_v26, %s712_s19 }
 0x118   :  { %390 = vrot.lane.b32.xlu2 %v804_v26, %s713_s20 }
 0x11f   :  { %394 = vrot.lane.b32.xlu1 %v804_v26, %s714_s21  ;;  %396 = vrot.lane.b32.xlu0 %v807_v28, %s714_s21 }
 0x127   :  { %392 = vrot.lane.b32.xlu0 %v807_v28, %s713_s20 }
 0x161   :  { %v233_v35 = vpop.permute.xlu2 %232 }
 0x16a   :  { %v235_v36 = vpop.permute.xlu2 %234 }
 0x172   :  { %v391_v37 = vpop.permute.xlu2 %390 }
 0x181   :  { %v239_v29 = vpop.permute.xlu1 %238  ;;  %v139_v30 = vpop.permute.xlu0 %138 }
 0x182   :  { %635 = vmatpush.xpose.msk.msra.mxu3 %vm44_vm0, %v139_v30 }
 0x189   :  { %v137_v31 = vpop.permute.xlu0 %136  ;;  %v237_v32 = vpop.permute.xlu1 %236 }
 0x18a   :  { %636 = vmatpush.xpose.msk.msra.mxu3 %vm44_vm0, %v137_v31 }
 0x18d   :  { %637 = vmatmul.msk.f32.vlgmr.msra.gmra.mxu3 %vm44_vm0, %v804_v26 }
 0x18e   :  { %641 = vmatpush.xpose.msk.msrb.mxu3 %vm44_vm0, %v239_v29 }
 0x191   :  { %v397_v33 = vpop.permute.xlu0 %396  ;;  %v395_v34 = vpop.permute.xlu1 %394 }
 0x192   :  { %642 = vmatpush.xpose.msk.msrb.mxu3 %vm44_vm0, %v237_v32 }
 0x195   :  { %638 = vmatmul.msk.f32.gmra.mxu3 %vm44_vm0, %v807_v28 }
 0x196   :  { %651 = vmatpush.xpose.msk.msra.mxu3 %vm44_vm0, %v397_v33  ;;  %v128_v33 = vpop.f32.mrf.mxu2 }
 0x199   :  { %v393_v38 = vpop.permute.xlu0 %392 }
 0x19a   :  { %652 = vmatpush.xpose.msk.msra.mxu3 %vm44_vm0, %v395_v34 }
 0x19d   :  { %643 = vmatmul.msk.f32.vlgmr.msrb.gmra.mxu3 %vm44_vm0, %v233_v35 }
 0x1a5   :  { %644 = vmatmul.msk.f32.gmra.mxu3 %vm44_vm0, %v235_v36 }
 0x1ad   :  { %653 = vmatmul.msk.f32.vlgmr.msra.gmra.mxu3 %vm44_vm0, %v391_v37  ;;  %v131_v37 = vpop.f32.mrf.mxu2 }
 0x1b5   :  { %654 = vmatmul.msk.f32.gmra.mxu3 %vm44_vm0, %v393_v38 }
 0x210   :  { %v165_v39 = vpop.f32.mrf.mxu3 }
 0x211   :  { %v171_v50 = vmul.f32 0.25, %v165_v39  ;;  %v78_v39 = vperm.slane %v801_v23, 1  ;;  %v33_v23 = vld [vmem:[%s911_s1 + $0xb0] sm:$0xff] }
 0x212   :  { %352 = vmatpush.msrb.mxu2 %v33_v23 }
 0x213   :  { %v173_v54 = vadd.f32 %v171_v50, %v13_v43 }
 0x215   :  { %v175_v57 = vsel %vm44_vm0, %v173_v54, -inf }
 0x218   :  { %v168_v40 = vpop.f32.mrf.mxu3 }
 0x219   :  { %v172_v56 = vmul.f32 0.25, %v168_v40 }
 0x21b   :  { %v174_v61 = vadd.f32 %v172_v56, %v14_v48 }
 0x21d   :  { %v178_v63 = vsel %vm44_vm0, %v174_v61, -inf }
 0x220   :  { %v265_v41 = vpop.f32.mrf.mxu3 }
 0x221   :  { %v271_v42 = vmul.f32 0.25, %v265_v41  ;;  %v132_v41 = vadd.f32 %v131_v37, %v78_v39 }
 0x223   :  { %v273_v44 = vadd.f32 %v271_v42, %v13_v43  ;;  %v129_v42 = vadd.f32 %v128_v33, %v78_v39 }
 0x225   :  { %v275_v45 = vsel %vm44_vm0, %v273_v44, -inf }
 0x226   :  { %276 = vmax.xlane.f32.xlu1 %v275_v45 }
 0x228   :  { %v268_v46 = vpop.f32.mrf.mxu3 }
 0x229   :  { %v272_v47 = vmul.f32 0.25, %v268_v46 }
 0x22b   :  { %v274_v49 = vadd.f32 %v272_v47, %v14_v48 }
 0x22d   :  { %v278_v51 = vsel %vm44_vm0, %v274_v49, -inf }
 0x22e   :  { %279 = vmax.xlane.f32.xlu2 %v278_v51 }
 0x230   :  { %v423_v52 = vpop.f32.mrf.mxu3 }
 0x231   :  { %v429_v53 = vmul.f32 0.25, %v423_v52 }
 0x233   :  { %v431_v55 = vadd.f32 %v429_v53, %v13_v43 }
 0x235   :  { %v433_v58 = vsel %vm44_vm0, %v431_v55, -inf }
 0x236   :  { %176 = vmax.xlane.f32.xlu2 %v175_v57  ;;  %434 = vmax.xlane.f32.xlu0 %v433_v58 }
 0x238   :  { %v426_v59 = vpop.f32.mrf.mxu3 }
 0x239   :  { %v430_v60 = vmul.f32 0.25, %v426_v59 }
 0x23b   :  { %v432_v62 = vadd.f32 %v430_v60, %v14_v48 }
 0x23d   :  { %v436_v0 = vsel %vm44_vm0, %v432_v62, -inf }
 0x23e   :  { %179 = vmax.xlane.f32.xlu2 %v178_v63  ;;  %437 = vmax.xlane.f32.xlu1 %v436_v0  ;;  %v32_v0 = vld [vmem:[%s911_s1 + $0xa0] sm:$0xff] }
 0x23f   :  { %353 = vmatpush.msrb.mxu2 %v32_v0 }
 0x257   :  { %669 = vrot.lane.b32.xlu1 %v668_v1, %s715_s26 }
 0x299   :  { %v277_v2 = vpop.xlane.xlu1 %276 }
 0x29a   :  { %v281_v3 = vsub.f32 %v273_v44, %v277_v2  ;;  %v30_v2 = vld [vmem:[%s911_s1 + $0x80] sm:$0xff] }
 0x29c   :  { %v283_v4 = vmul.f32 1.442695, %v281_v3  ;;  %v35_v3 = vld [vmem:[%s911_s1 + $0xd0] sm:$0xff] }
 0x29d   :  { %504 = vmatpush.msra.mxu2 %v35_v3 }
 0x29e   :  { %678 = vpow2.f32 %v283_v4 }
 0x2a1   :  { %v280_v5 = vpop.xlane.xlu2 %279 }
 0x2a2   :  { %v282_v12 = vsub.f32 %v274_v49, %v280_v5  ;;  %v34_v5 = vld [vmem:[%s911_s1 + $0xc0] sm:$0xff] }
 0x2a3   :  { %505 = vmatpush.msra.mxu2 %v34_v5 }
 0x2a4   :  { %v679_v6 = vpop.eup %678  ;;  %v285_v15 = vmul.f32 1.442695, %v282_v12 }
 0x2a5   :  { %v287_v7 = vsel %vm44_vm0, %v679_v6, 0.0 }
 0x2a6   :  { %288 = vadd.xlane.f32.xlu0 %v287_v7 }
 0x2a9   :  { %v177_v8 = vpop.xlane.xlu2 %176  ;;  %v435_v9 = vpop.xlane.xlu0 %434 }
 0x2aa   :  { %v181_v10 = vsub.f32 %v173_v54, %v177_v8  ;;  %v439_v11 = vsub.f32 %v431_v55, %v435_v9 }
 0x2ac   :  { %v183_v13 = vmul.f32 1.442695, %v181_v10  ;;  %v441_v14 = vmul.f32 1.442695, %v439_v11 }
 0x2ae   :  { %680 = vpow2.f32 %v183_v13 }
 0x2af   :  { %682 = vpow2.f32 %v441_v14 }
 0x2b0   :  { %684 = vpow2.f32 %v285_v15  ;;  %v39_v15 = vld [vmem:[%s911_s1 + $0xe2] ss:$0 sm:$0xff] }
 0x2b1   :  { %v438_v16 = vpop.xlane.xlu1 %437  ;;  %v180_v17 = vpop.xlane.xlu2 %179 }
 0x2b2   :  { %v440_v18 = vsub.f32 %v432_v62, %v438_v16  ;;  %v182_v25 = vsub.f32 %v174_v61, %v180_v17 }
 0x2b4   :  { %v681_v20 = vpop.eup %680  ;;  %v443_v21 = vmul.f32 1.442695, %v440_v18  ;;  %v185_v28 = vmul.f32 1.442695, %v182_v25 }
 0x2b5   :  { %v683_v24 = vpop.eup %682  ;;  %v187_v26 = vsel %vm44_vm0, %v681_v20, 0.0 }
 0x2b6   :  { %188 = vadd.xlane.f32.xlu2 %v187_v26  ;;  %v445_v27 = vsel %vm44_vm0, %v683_v24, 0.0  ;;  %686 = vpow2.f32 %v443_v21  ;;  %v685_v29 = vpop.eup %684 }
 0x2b7   :  { %446 = vadd.xlane.f32.xlu0 %v445_v27  ;;  %688 = vpow2.f32 %v185_v28  ;;  %v290_v31 = vsel %vm44_vm0, %v685_v29, 0.0 }
 0x2bc   :  { %v687_v30 = vpop.eup %686 }
 0x2bd   :  { %v448_v32 = vsel %vm44_vm0, %v687_v30, 0.0  ;;  %v689_v34 = vpop.eup %688 }
 0x2be   :  { %291 = vadd.xlane.f32.xlu2 %v290_v31  ;;  %v190_v35 = vsel %vm44_vm0, %v689_v34, 0.0  ;;  %v717_v31 = vmov 48.0  }
 0x2bf   :  { %449 = vadd.xlane.f32.xlu0 %v448_v32 }
 0x2c7   :  { %191 = vadd.xlane.f32.xlu0 %v190_v35 }
 0x2c9   :  { %v670_v36 = vpop.permute.xlu1 %669 }
 0x2ca   :  { %v671_v38 = vunpack.i.l.bf16 %v670_v36  ;;  %v672_v40 = vunpack.i.h.bf16 %v670_v36 }
 0x2cc   :  { %323 = vmatpush.msrb.mxu1 %v671_v38 }
 0x2ce   :  { %324 = vmatpush.msrb.mxu1 %v672_v40 }
 0x2d0   :  { %475 = vmatpush.msra.mxu1 %v132_v41 }
 0x2d2   :  { %476 = vmatpush.msra.mxu1 %v129_v42 }
 0x2d6   :  { %674 = vrot.lane.b32.xlu2 %v668_v1, %s716_s27  ;;  %v31_v1 = vld [vmem:[%s911_s1 + $0x90] sm:$0xff] }
 0x319   :  { %v289_v43 = vpop.xlane.xlu0 %288 }
 0x31a   :  { %690 = vrcp.f32 %v289_v43 }
 0x320   :  { %v691_v44 = vpop.eup %690 }
 0x321   :  { %v295_v45 = vmul.f32 %v691_v44, %v679_v6 }
 0x323   :  { %645 = vmatmul.msk.f32.vlgmr.msrb.gmra.mxu1 %vm44_vm0, %v295_v45 }
 0x329   :  { %v189_v46 = vpop.xlane.xlu2 %188 }
 0x32a   :  { %v447_v47 = vpop.xlane.xlu0 %446 }
 0x331   :  { %v292_v48 = vpop.xlane.xlu2 %291 }
 0x332   :  { %692 = vrcp.f32 %v292_v48  ;;  %v450_v49 = vpop.xlane.xlu0 %449 }
 0x333   :  { %694 = vrcp.f32 %v189_v46 }
 0x334   :  { %696 = vrcp.f32 %v447_v47 }
 0x338   :  { %v693_v50 = vpop.eup %692 }
 0x339   :  { %v675_v51 = vpop.permute.xlu2 %674  ;;  %v296_v52 = vmul.f32 %v693_v50, %v685_v29  ;;  %v695_v53 = vpop.eup %694 }
 0x33a   :  { %v192_v54 = vpop.xlane.xlu0 %191  ;;  %v676_v55 = vunpack.i.l.bf16 %v675_v51  ;;  %v677_v56 = vunpack.i.h.bf16 %v675_v51  ;;  %v195_v57 = vmul.f32 %v695_v53, %v681_v20  ;;  %v697_v58 = vpop.eup %696 }
 0x33b   :  { %646 = vmatmul.msk.f32.gmra.mxu1 %vm44_vm0, %v296_v52  ;;  %698 = vrcp.f32 %v192_v54  ;;  %v453_v59 = vmul.f32 %v697_v58, %v683_v24 }
 0x33c   :  { %223 = vmatpush.msrb.mxu0 %v676_v55  ;;  %700 = vrcp.f32 %v450_v49  ;;  %v15_v49 = vld [vmem:[%s912_s0 + $0x20] sm:$0x3] }
 0x33d   :  { %702 = vrcp.f32 %v717_v31  ;;  %v598_v51 = vsel %vm597_vm3, %v15_v49, 0.0 }
 0x33e   :  { %224 = vmatpush.msrb.mxu0 %v677_v56 }
 0x33f   :  { %639 = vmatmul.msk.f32.vlgmr.msrb.gmra.mxu0 %vm44_vm0, %v195_v57 }
 0x340   :  { %381 = vmatpush.msra.mxu0 %v31_v1 }
 0x341   :  { %v699_v60 = vpop.eup %698 }
 0x342   :  { %v196_v61 = vmul.f32 %v699_v60, %v689_v34  ;;  %v701_v62 = vpop.eup %700  ;;  %382 = vmatpush.msra.mxu0 %v30_v2 }
 0x343   :  { %655 = vmatmul.msk.f32.vlgmr.msra.gmra.mxu1 %vm44_vm0, %v453_v59  ;;  %v454_v63 = vmul.f32 %v701_v62, %v687_v30  ;;  %v703_v32 = vpop.eup %702 }
 0x344   :  { %v526_v33 = vmul.f32 48.0, %v703_v32  ;;  %vm530_vm2 = vweird.f32 %v703_v32 }
 0x346   :  { %v527_v34 = vsub.f32 1.0, %v526_v33 }
 0x347   :  { %640 = vmatmul.msk.f32.gmra.mxu0 %vm44_vm0, %v196_v61 }
 0x348   :  { %v528_v35 = vmul.f32 %v703_v32, %v527_v34 }
 0x34a   :  { %v529_v36 = vadd.f32 %v703_v32, %v528_v35 }
 0x34b   :  { %656 = vmatmul.msk.f32.gmra.mxu1 %vm44_vm0, %v454_v63 }
 0x3a0   :  { %v326_v4 = vpop.f32.mrf.mxu1 }
 0x3a1   :  { %647 = vmatmul.msk.f32.vlgmr.msrb.gmra.mxu2 %vm44_vm0, %v326_v4  ;;  %v40_v4 = vld [vmem:[%s911_s1 + $0xe3] ss:$0 sm:$0xff] }
 0x3b8   :  { %v329_v6 = vpop.f32.mrf.mxu1 }
 0x3b9   :  { %648 = vmatmul.msk.f32.gmra.mxu2 %vm44_vm0, %v329_v6 }
 0x3bc   :  { %v226_v7 = vpop.f32.mrf.mxu0 }
 0x3bd   :  { %649 = vmatmul.msk.f32.vlgmr.msra.gmra.mxu0 %vm44_vm0, %v226_v7 }
 0x3c0   :  { %v478_v8 = vpop.f32.mrf.mxu1 }
 0x3c1   :  { %657 = vmatmul.msk.f32.vlgmr.msra.gmra.mxu2 %vm44_vm0, %v478_v8  ;;  %v41_v8 = vld [vmem:[%s911_s1 + $0xe4] ss:$0 sm:$0xff] }
 0x3c4   :  { %v229_v9 = vpop.f32.mrf.mxu0 }
 0x3c5   :  { %650 = vmatmul.msk.f32.gmra.mxu0 %vm44_vm0, %v229_v9 }
 0x3c8   :  { %v481_v10 = vpop.f32.mrf.mxu1 }
 0x3c9   :  { %658 = vmatmul.msk.f32.gmra.mxu2 %vm44_vm0, %v481_v10 }
 0x424   :  { %v355_v11 = vpop.f32.mrf.mxu2 }
 0x43a   :  { %v384_v13 = vpop.f32.mrf.mxu0 }
 0x43b   :  { %v385_v14 = vadd.f32 %v384_v13, %v355_v11  ;;  %v42_v11 = vld [vmem:[%s911_s1 + $0xe5] ss:$0 sm:$0xff] }
 0x43c   :  { %v358_v12 = vpop.f32.mrf.mxu2 }
 0x442   :  { %v387_v20 = vpop.f32.mrf.mxu0 }
 0x443   :  { %v388_v24 = vadd.f32 %v387_v20, %v358_v12 }
 0x444   :  { %v507_v16 = vpop.f32.mrf.mxu2 }
 0x445   :  { %v513_v17 = vadd.f32 %v507_v16, %v385_v14 }
 0x447   :  { %v515_v18 = vadd.f32 %v513_v17, %v39_v15 }
 0x449   :  { %v517_v21 = vadd.f32 %v515_v18, %v786_v19  ;;  %v531_v19 = vsel %vm530_vm2, %v703_v32, %v529_v36 }
 0x44b   :  { %v519_v25 = vsel %vm81_vm1, %v517_v21, 0.0 }
 0x44c   :  { %v510_v26 = vpop.f32.mrf.mxu2  ;;  %520 = vadd.xlane.f32.xlu0 %v519_v25 }
 0x44d   :  { %v514_v27 = vadd.f32 %v510_v26, %v388_v24 }
 0x44f   :  { %v516_v28 = vadd.f32 %v514_v27, %v39_v15 }
 0x451   :  { %v518_v29 = vadd.f32 %v516_v28, %v792_v22  ;;  %v43_v28 = vld [vmem:[%s911_s1 + $0xe6] ss:$0 sm:$0xff] }
 0x453   :  { %v522_v30 = vsel %vm81_vm1, %v518_v29, 0.0 }
 0x454   :  { %523 = vadd.xlane.f32.xlu1 %v522_v30 }
 0x4bf   :  { %v521_v37 = vpop.xlane.xlu0 %520 }
 0x4c0   :  { %v532_v38 = vmul.f32 %v531_v19, %v521_v37 }
 0x4c2   :  { %v534_v39 = vsub.f32 %v517_v21, %v532_v38 }
 0x4c4   :  { %v536_v40 = vmul.f32 %v534_v39, %v534_v39 }
 0x4c6   :  { %v538_v41 = vsel %vm81_vm1, %v536_v40, 0.0 }
 0x4c7   :  { %v524_v42 = vpop.xlane.xlu1 %523  ;;  %539 = vadd.xlane.f32.xlu2 %v538_v41 }
 0x4c8   :  { %v533_v22 = vmul.f32 %v531_v19, %v524_v42 }
 0x4ca   :  { %v535_v43 = vsub.f32 %v518_v29, %v533_v22 }
 0x4cc   :  { %v537_v44 = vmul.f32 %v535_v43, %v535_v43 }
 0x4ce   :  { %v541_v45 = vsel %vm81_vm1, %v537_v44, 0.0 }
 0x4cf   :  { %542 = vadd.xlane.f32.xlu0 %v541_v45 }
 0x4d7   :  { %599 = vadd.xlane.f32.xlu0 %v598_v51 }
 0x53a   :  { %v540_v46 = vpop.xlane.xlu2 %539 }
 0x53b   :  { %v544_v47 = vmul.f32 %v540_v46, %v531_v19 }
 0x53d   :  { %v546_v23 = vadd.f32 1e-05, %v544_v47 }
 0x53f   :  { %704 = vrsqrt.f32 %v546_v23  ;;  %vm554_vm5 = vweird.f32 %v546_v23 }
 0x542   :  { %v543_v48 = vpop.xlane.xlu0 %542 }
 0x543   :  { %v545_v50 = vmul.f32 %v543_v48, %v531_v19 }
 0x545   :  { %v705_v52 = vpop.eup %704  ;;  %v547_v53 = vadd.f32 1e-05, %v545_v50 }
 0x546   :  { %v549_v54 = vmul.f32 %v705_v52, %v546_v23  ;;  %vm555_vm4 = vweird.f32 %v705_v52 }
 0x547   :  { %706 = vrsqrt.f32 %v547_v53  ;;  %vm556_vm6 = vmor %vm554_vm5, %vm555_vm4  ;;  %vm564_vm8 = vweird.f32 %v547_v53 }
 0x548   :  { %v550_v55 = vmul.f32 %v705_v52, %v549_v54 }
 0x54a   :  { %v551_v56 = vmul.f32 0.5, %v550_v55  ;;  %v600_v15 = vpop.xlane.xlu0 %599 }
 0x54b   :  { %708 = vrcp.f32 %v600_v15  ;;  %vm611_vm11 = vweird.f32 %v600_v15  ;;  %v617_v21 = vand.u32 2147483648, %v600_v15  ;;  %v615_v25 = vand.u32 2147483647, %v600_v15 }
 0x54c   :  { %v552_v57 = vsub.f32 1.5, %v551_v56 }
 0x54d   :  { %v707_v58 = vpop.eup %706  ;;  %v618_v26 = vor.u32 1.1754944e-38, %v617_v21  ;;  %vm616_vm14 = vcmp.eq.f32.partialorder %v615_v25, 8.507059e+37 }
 0x54e   :  { %v559_v59 = vmul.f32 %v707_v58, %v547_v53  ;;  %v553_v60 = vmul.f32 %v705_v52, %v552_v57  ;;  %vm565_vm7 = vweird.f32 %v707_v58 }
 0x54f   :  { %vm566_vm9 = vmor %vm564_vm8, %vm565_vm7 }
 0x550   :  { %v560_v61 = vmul.f32 %v707_v58, %v559_v59  ;;  %v557_v63 = vsel %vm556_vm6, %v705_v52, %v553_v60 }
 0x551   :  { %v568_v2 = vmul.f32 %v557_v63, %v534_v39  ;;  %v709_v16 = vpop.eup %708 }
 0x552   :  { %v561_v62 = vmul.f32 0.5, %v560_v61  ;;  %v607_v17 = vmul.f32 %v709_v16, %v600_v15  ;;  %vm612_vm12 = vweird.f32 %v709_v16 }
 0x553   :  { %v570_v7 = vmul.f32 %v568_v2, %v40_v4  ;;  %vm613_vm13 = vmor %vm611_vm11, %vm612_vm12 }
 0x554   :  { %v562_v0 = vsub.f32 1.5, %v561_v62  ;;  %v608_v18 = vsub.f32 1.0, %v607_v17 }
 0x555   :  { %v572_v10 = vadd.f32 %v570_v7, %v41_v8 }
 0x556   :  { %v563_v1 = vmul.f32 %v707_v58, %v562_v0  ;;  %v609_v20 = vmul.f32 %v709_v16, %v608_v18 }
 0x558   :  { %v567_v3 = vsel %vm566_vm9, %v707_v58, %v563_v1  ;;  %v610_v24 = vadd.f32 %v709_v16, %v609_v20 }
 0x559   :  { %v569_v5 = vmul.f32 %v567_v3, %v535_v43 }
 0x55a   :  { %v614_v27 = vsel %vm613_vm13, %v709_v16, %v610_v24 }
 0x55b   :  { %v571_v6 = vmul.f32 %v569_v5, %v40_v4  ;;  %v619_v29 = vsel %vm616_vm14, %v618_v26, %v614_v27 }
 0x55d   :  { %v573_v9 = vadd.f32 %v571_v6, %v41_v8 }
 0x55f   :  { %591 = vmatpush.msrb.mxu0 %v573_v9 }
 0x561   :  { %592 = vmatpush.msrb.mxu0 %v572_v10 }
 0x562   :  { %659 = vmatmul.msk.f32.vlgmr.msrb.gmra.mxu0 %vm44_vm0, %v15_v49 }
 0x5df   :  { %v594_v12 = vpop.f32.mrf.mxu0 }
 0x5e0   :  { %v601_v13 = vmul.f32 %v594_v12, %v42_v11 }
 0x5e2   :  { %v603_v14 = vsel %vm602_vm10, %v601_v13, 0.0 }
 0x5e3   :  { %604 = vadd.xlane.f32.xlu0 %v603_v14 }
 0x656   :  { %v605_v30 = vpop.xlane.xlu0 %604 }
 0x657   :  { %v620_v31 = vmul.f32 %v619_v29, %v605_v30 }
 0x659   :  { %v621_v32 = vadd.f32 %v620_v31, %v43_v28 }
 0x65b   :  { %623 = vst.msk [vmem:[%s913_s2] sm:$0x3] %vm622_vm15, %v621_v32 }

</bundles_post_ra>
